<compile_context>
chip_gen: v7x
topology: tpu7x:2x2x1
jax: 0.10.0
libtpu: 0.0.40
codegen_flags: <defaults>
</compile_context>

<pallas_src>
import jax
import jax.numpy as jnp
from jax.experimental import pallas as pl
from jax.experimental.pallas import tpu as pltpu

IN_DIM = 28 * 28      # 784
H1, H2, H3 = 256, 128, 64
OUT_DIM = 10
OUT_PAD = 128         # lane-dense padded logits width


def mlp_kernel(x_ref, w1_ref, w2_ref, w3_ref, w4_ref, b_ref, o_ref):
    # Whole 4-layer MLP for one batch tile. Weights are bf16, accumulation f32.
    b1 = b_ref[0:1, 0:H1]
    b2 = b_ref[1:2, 0:H2]
    b3 = b_ref[2:3, 0:H3]
    b4 = b_ref[3:4, 0:OUT_PAD]

    x = x_ref[...].astype(jnp.bfloat16)
    h = jnp.dot(x, w1_ref[...], preferred_element_type=jnp.float32) + b1
    h = jnp.maximum(h, 0.0)
    h = jnp.dot(h.astype(jnp.bfloat16), w2_ref[...],
                preferred_element_type=jnp.float32) + b2
    h = jnp.maximum(h, 0.0)
    h = jnp.dot(h.astype(jnp.bfloat16), w3_ref[...],
                preferred_element_type=jnp.float32) + b3
    h = jnp.maximum(h, 0.0)
    h = jnp.dot(h.astype(jnp.bfloat16), w4_ref[...],
                preferred_element_type=jnp.float32) + b4
    o_ref[...] = h.astype(o_ref.dtype)


def neural_network_forward(x, params, *, tm=256):
    """x: [B, 1, 28, 28] (or [B, 28, 28]) float32. Returns logits [B, 10]."""
    B = x.shape[0]
    x2d = x.reshape(B, -1).astype(jnp.float32)   # == x.view(x.size(0), -1)
    assert x2d.shape[1] == IN_DIM

    w1, w2, w3, w4p, bias_pack = params

    # Batch tile: full batch if it fits (blocks equal to full dims are always
    # legal), otherwise 256-row tiles (matches v6e/v7x MXU; use tm=128 on v5e).
    TM = B if B <= tm else tm
    grid = (pl.cdiv(B, TM),)

    w_spec = lambda shape: pl.BlockSpec(shape, lambda i: (0, 0))  # weights stay resident

    out_padded = pl.pallas_call(
        mlp_kernel,
        out_shape=jax.ShapeDtypeStruct((B, OUT_PAD), jnp.float32),
        grid=grid,
        in_specs=[
            pl.BlockSpec((TM, IN_DIM), lambda i: (i, 0)),
            w_spec(w1.shape), w_spec(w2.shape), w_spec(w3.shape),
            w_spec(w4p.shape), w_spec(bias_pack.shape),
        ],
        out_specs=pl.BlockSpec((TM, OUT_PAD), lambda i: (i, 0)),
        compiler_params=pltpu.CompilerParams(
            dimension_semantics=("parallel",),
            vmem_limit_bytes=16 << 20,
        ),
    )(x2d, w1, w2, w3, w4p, bias_pack)

    return out_padded[:, :OUT_DIM]


def init_params(key):
    """Deterministic init mimicking torch.nn.Linear (uniform +/- 1/sqrt(fan_in)).
    Returns kernel-ready params:
      w1..w3: [in, out] bf16; w4: [64, 128] bf16 (cols 10:128 zero);
      bias_pack: f32 [4, 256] (row l = layer-l bias, zero-padded)."""
    dims = [(IN_DIM, H1), (H1, H2), (H2, H3), (H3, OUT_DIM)]
    weights = []
    bias_pack = jnp.zeros((4, H1), jnp.float32)
    for layer, (fan_in, fan_out) in enumerate(dims):
        key, kw, kb = jax.random.split(key, 3)
        bound = 1.0 / jnp.sqrt(jnp.float32(fan_in))
        w = jax.random.uniform(kw, (fan_in, fan_out), jnp.float32, -bound, bound)
        b = jax.random.uniform(kb, (fan_out,), jnp.float32, -bound, bound)
        weights.append(w)
        bias_pack = bias_pack.at[layer, :fan_out].set(b)
    w1, w2, w3, w4 = [w.astype(jnp.bfloat16) for w in weights]
    w4p = jnp.zeros((H3, OUT_PAD), jnp.bfloat16).at[:, :OUT_DIM].set(w4)
    return (w1, w2, w3, w4p, bias_pack)


def reference_forward(x, params):
    """Plain-JAX reference mirroring the kernel math (bf16 weights, f32 accum)."""
    w1, w2, w3, w4p, bias_pack = params
    B = x.shape[0]
    h = x.reshape(B, -1).astype(jnp.float32)
    b1 = bias_pack[0:1, :H1]
    b2 = bias_pack[1:2, :H2]
    b3 = bias_pack[2:3, :H3]
    b4 = bias_pack[3:4, :OUT_PAD]
    h = jnp.maximum(jnp.dot(h.astype(jnp.bfloat16), w1,
                            preferred_element_type=jnp.float32) + b1, 0.0)
    h = jnp.maximum(jnp.dot(h.astype(jnp.bfloat16), w2,
                            preferred_element_type=jnp.float32) + b2, 0.0)
    h = jnp.maximum(jnp.dot(h.astype(jnp.bfloat16), w3,
                            preferred_element_type=jnp.float32) + b3, 0.0)
    h = jnp.dot(h.astype(jnp.bfloat16), w4p,
                preferred_element_type=jnp.float32) + b4
    return h[:, :OUT_DIM]


if __name__ == "__main__":
    key = jax.random.PRNGKey(0)
    k_x, k_p = jax.random.split(key)

    B = 2
    x = jax.random.normal(k_x, (B, 1, 28, 28), dtype=jnp.float32)  # NCHW MNIST-like
    params = init_params(k_p)

    out = neural_network_forward(x, params)
    out = jax.block_until_ready(out)

    ref = reference_forward(x, params)
    assert out.shape == (B, OUT_DIM)
    assert jnp.allclose(out, ref, atol=1e-3, rtol=1e-3), \
        float(jnp.max(jnp.abs(out - ref)))

    print("KERNEL_OK")
</pallas_src>

<mosaic_0001>
module attributes {stable_mosaic.version = 11 : i64} {
  func.func @mlp_kernel(%arg0: i32, %arg1: memref<2x784xf32, #tpu.memory_space<vmem>>, %arg2: memref<784x256xbf16, #tpu.memory_space<vmem>>, %arg3: memref<256x128xbf16, #tpu.memory_space<vmem>>, %arg4: memref<128x64xbf16, #tpu.memory_space<vmem>>, %arg5: memref<64x128xbf16, #tpu.memory_space<vmem>>, %arg6: memref<4x256xf32, #tpu.memory_space<vmem>>, %arg7: memref<2x128xf32, #tpu.memory_space<vmem>>) attributes {dimension_semantics = [#tpu.dimension_semantics<parallel>], iteration_bounds = array<i64: 1>, scalar_prefetch = 0 : i64, scratch_operands = 0 : i64, tpu.core_type = #tpu.core_type<tc>, window_params = [{transform_indices = @transform_0, window_bounds = array<i64: 2, 784>}, {pipeline_mode = #tpu.pipeline_mode<synchronous>, transform_indices = @transform_1, window_bounds = array<i64: 784, 256>}, {pipeline_mode = #tpu.pipeline_mode<synchronous>, transform_indices = @transform_2, window_bounds = array<i64: 256, 128>}, {pipeline_mode = #tpu.pipeline_mode<synchronous>, transform_indices = @transform_3, window_bounds = array<i64: 128, 64>}, {pipeline_mode = #tpu.pipeline_mode<synchronous>, transform_indices = @transform_4, window_bounds = array<i64: 64, 128>}, {pipeline_mode = #tpu.pipeline_mode<synchronous>, transform_indices = @transform_5, window_bounds = array<i64: 4, 256>}, {transform_indices = @transform_6, window_bounds = array<i64: 2, 128>}]} {
    %c0 = arith.constant 0 : index
    %c0_0 = arith.constant 0 : index
    %0 = vector.load %arg6[%c0, %c0_0] : memref<4x256xf32, #tpu.memory_space<vmem>>, vector<1x256xf32>
    %c1 = arith.constant 1 : index
    %c0_1 = arith.constant 0 : index
    %1 = vector.load %arg6[%c1, %c0_1] : memref<4x256xf32, #tpu.memory_space<vmem>>, vector<1x128xf32>
    %c2 = arith.constant 2 : index
    %c0_2 = arith.constant 0 : index
    %2 = vector.load %arg6[%c2, %c0_2] : memref<4x256xf32, #tpu.memory_space<vmem>>, vector<1x64xf32>
    %c3 = arith.constant 3 : index
    %c0_3 = arith.constant 0 : index
    %3 = vector.load %arg6[%c3, %c0_3] : memref<4x256xf32, #tpu.memory_space<vmem>>, vector<1x128xf32>
    %c0_4 = arith.constant 0 : index
    %c0_5 = arith.constant 0 : index
    %4 = vector.load %arg1[%c0_4, %c0_5] : memref<2x784xf32, #tpu.memory_space<vmem>>, vector<2x784xf32>
    %5 = arith.truncf %4 : vector<2x784xf32> to vector<2x784xbf16>
    %c0_6 = arith.constant 0 : index
    %c0_7 = arith.constant 0 : index
    %6 = vector.load %arg2[%c0_6, %c0_7] : memref<784x256xbf16, #tpu.memory_space<vmem>>, vector<784x256xbf16>
    %cst = arith.constant dense<0.000000e+00> : vector<2x256xf32>
    %7 = tpu.matmul %5, %6, %cst {dimension_numbers = #tpu.dot_dimension_numbers<[1], [0], [0], [1], [0, 0, 1, 1], [], []>} : vector<2x784xbf16>, vector<784x256xbf16>, vector<2x256xf32> -> vector<2x256xf32>
    %8 = vector.broadcast %0 : vector<1x256xf32> to vector<2x256xf32>
    %9 = arith.addf %7, %8 : vector<2x256xf32>
    %cst_8 = arith.constant 0.000000e+00 : f32
    %10 = vector.broadcast %cst_8 : f32 to vector<2x256xf32>
    %11 = arith.maximumf %9, %10 : vector<2x256xf32>
    %12 = arith.truncf %11 : vector<2x256xf32> to vector<2x256xbf16>
    %c0_9 = arith.constant 0 : index
    %c0_10 = arith.constant 0 : index
    %13 = vector.load %arg3[%c0_9, %c0_10] : memref<256x128xbf16, #tpu.memory_space<vmem>>, vector<256x128xbf16>
    %cst_11 = arith.constant dense<0.000000e+00> : vector<2x128xf32>
    %14 = tpu.matmul %12, %13, %cst_11 {dimension_numbers = #tpu.dot_dimension_numbers<[1], [0], [0], [1], [0, 0, 1, 1], [], []>} : vector<2x256xbf16>, vector<256x128xbf16>, vector<2x128xf32> -> vector<2x128xf32>
    %15 = vector.broadcast %1 : vector<1x128xf32> to vector<2x128xf32>
    %16 = arith.addf %14, %15 : vector<2x128xf32>
    %cst_12 = arith.constant 0.000000e+00 : f32
    %17 = vector.broadcast %cst_12 : f32 to vector<2x128xf32>
    %18 = arith.maximumf %16, %17 : vector<2x128xf32>
    %19 = arith.truncf %18 : vector<2x128xf32> to vector<2x128xbf16>
    %c0_13 = arith.constant 0 : index
    %c0_14 = arith.constant 0 : index
    %20 = vector.load %arg4[%c0_13, %c0_14] : memref<128x64xbf16, #tpu.memory_space<vmem>>, vector<128x64xbf16>
    %cst_15 = arith.constant dense<0.000000e+00> : vector<2x64xf32>
    %21 = tpu.matmul %19, %20, %cst_15 {dimension_numbers = #tpu.dot_dimension_numbers<[1], [0], [0], [1], [0, 0, 1, 1], [], []>} : vector<2x128xbf16>, vector<128x64xbf16>, vector<2x64xf32> -> vector<2x64xf32>
    %22 = vector.broadcast %2 : vector<1x64xf32> to vector<2x64xf32>
    %23 = arith.addf %21, %22 : vector<2x64xf32>
    %cst_16 = arith.constant 0.000000e+00 : f32
    %24 = vector.broadcast %cst_16 : f32 to vector<2x64xf32>
    %25 = arith.maximumf %23, %24 : vector<2x64xf32>
    %26 = arith.truncf %25 : vector<2x64xf32> to vector<2x64xbf16>
    %c0_17 = arith.constant 0 : index
    %c0_18 = arith.constant 0 : index
    %27 = vector.load %arg5[%c0_17, %c0_18] : memref<64x128xbf16, #tpu.memory_space<vmem>>, vector<64x128xbf16>
    %cst_19 = arith.constant dense<0.000000e+00> : vector<2x128xf32>
    %28 = tpu.matmul %26, %27, %cst_19 {dimension_numbers = #tpu.dot_dimension_numbers<[1], [0], [0], [1], [0, 0, 1, 1], [], []>} : vector<2x64xbf16>, vector<64x128xbf16>, vector<2x128xf32> -> vector<2x128xf32>
    %29 = vector.broadcast %3 : vector<1x128xf32> to vector<2x128xf32>
    %30 = arith.addf %28, %29 : vector<2x128xf32>
    %c0_20 = arith.constant 0 : index
    %c0_21 = arith.constant 0 : index
    %31 = vector.load %arg7[%c0_20, %c0_21] : memref<2x128xf32, #tpu.memory_space<vmem>>, vector<2x128xf32>
    tpu.vector_store %arg7[%c0_20, %c0_21], %30 {strides = array<i32>} : memref<2x128xf32, #tpu.memory_space<vmem>>, vector<2x128xf32>,
    return
  }
  func.func @transform_0(%arg0: i32) -> (i32, i32) {
    %c0_i32 = arith.constant 0 : i32
    %c0_i32_0 = arith.constant 0 : i32
    return %arg0, %c0_i32 : i32, i32
  }
  func.func @transform_1(%arg0: i32) -> (i32, i32) {
    %c0_i32 = arith.constant 0 : i32
    %c0_i32_0 = arith.constant 0 : i32
    %c0_i32_1 = arith.constant 0 : i32
    return %c0_i32, %c0_i32_0 : i32, i32
  }
  func.func @transform_2(%arg0: i32) -> (i32, i32) {
    %c0_i32 = arith.constant 0 : i32
    %c0_i32_0 = arith.constant 0 : i32
    %c0_i32_1 = arith.constant 0 : i32
    return %c0_i32, %c0_i32_0 : i32, i32
  }
  func.func @transform_3(%arg0: i32) -> (i32, i32) {
    %c0_i32 = arith.constant 0 : i32
    %c0_i32_0 = arith.constant 0 : i32
    %c0_i32_1 = arith.constant 0 : i32
    return %c0_i32, %c0_i32_0 : i32, i32
  }
  func.func @transform_4(%arg0: i32) -> (i32, i32) {
    %c0_i32 = arith.constant 0 : i32
    %c0_i32_0 = arith.constant 0 : i32
    %c0_i32_1 = arith.constant 0 : i32
    return %c0_i32, %c0_i32_0 : i32, i32
  }
  func.func @transform_5(%arg0: i32) -> (i32, i32) {
    %c0_i32 = arith.constant 0 : i32
    %c0_i32_0 = arith.constant 0 : i32
    %c0_i32_1 = arith.constant 0 : i32
    return %c0_i32, %c0_i32_0 : i32, i32
  }
  func.func @transform_6(%arg0: i32) -> (i32, i32) {
    %c0_i32 = arith.constant 0 : i32
    %c0_i32_0 = arith.constant 0 : i32
    return %arg0, %c0_i32 : i32, i32
  }
}

</mosaic_0001>

<bundles_post_ra>
// kernel: tpu_custom_call.1
= control target key start
LH: loop header
LB: loop body
LE: loop exit
PB: predicated region body
PF: predicated region fallthrough
CT: control target
= control target key end

     0   :  { %11 = vsyncpa [#allocation3], 0  ;;  %s1914_s0 = inlined_call_operand.vmem [shape: f32[2,784], index: 0, kind: input, shape index: {}]   ;;  %s1915_s1 = inlined_call_operand.hbm [shape: bf16[784,256], index: 1, kind: input, shape index: {}]   ;;  %s1916_s2 = inlined_call_operand.hbm [shape: bf16[256,128], index: 2, kind: input, shape index: {}]   ;;  %s1917_s3 = inlined_call_operand.vmem [shape: bf16[128,64], index: 3, kind: input, shape index: {}]   ;;  %s1918_s4 = inlined_call_operand.vmem [shape: bf16[64,128], index: 4, kind: input, shape index: {}]   ;;  %s1919_s5 = inlined_call_operand.vmem [shape: f32[4,256], index: 5, kind: input, shape index: {}]   ;;  %s1920_s6 = inlined_call_operand.hbm [shape: f32[2,128], index: 6, kind: output, shape index: {}]  }
   0x1   :  { %12 = vsyncpa [#allocation6], 0 }
   0x2   :  { %13 = vsyncpa [#allocation4], 0  ;;  %s1731_s21 = smov [#allocation2]   ;;  %s1659_s25 = scalar_lea.hbm %s1915_s1, 12544 }
   0x3   :  { %s21_s22 = sshll.u32 %s1731_s21, 4  ;;  %p1660_p0 = scmp.ne.s32.totalorder %s1915_s1, %s1659_s25  ;;  %s22_s22 = int_to_ptr.vmem [resolvable:$true] %s21_s22 }
   0x4   :  { %p1663_p1 = scmp.lt.u32.totalorder %s1659_s25, %s1915_s1 }
   0x6   :  { %p1665_p2 = pnand %p1663_p1, %p1660_p0 }
   0x8   :  { %1668 = shalt.err (!%p1665_p2)
}
   0x9   :  { %s1669_s30 = scalar_lea.vmem %s22_s22, 12544  ;;  %p1674_p4 = scmp.lt.s32.totalorder %s22_s22, %s22_s22 }
   0xa   :  { %p1670_p3 = scmp.ne.s32.totalorder %s22_s22, %s1669_s30  ;;  %p1675_p5 = scmp.lt.s32.totalorder %s1669_s30, %s1669_s30 }
   0xc   :  { %p1676_p6 = por %p1675_p5, %p1674_p4 }
   0xe   :  { %p1677_p7 = pnand %p1676_p6, %p1670_p3 }
  0x10   :  { %1680 = shalt.err (!%p1677_p7)
}
  0x11   :  { %s1732_s7 = smov 128   ;;  %s1733_s8 = smov 8  }
  0x12   :  { %27 = dma.hbm_to_vmem [thread:$0]  %s1915_s1, 12544, %s22_s22, [#allocation3], %s1732_s7, %s1732_s7, %s1733_s8  }
  0x13   :  { %s1734_s11 = smov [#allocation5]   ;;  %s1681_s15 = scalar_lea.hbm %s1916_s2, 2048 }
  0x14   :  { %s33_s12 = sshll.u32 %s1734_s11, 4  ;;  %p1682_p8 = scmp.ne.s32.totalorder %s1916_s2, %s1681_s15  ;;  %s34_s12 = int_to_ptr.vmem [resolvable:$true] %s33_s12 }
  0x15   :  { %p1685_p9 = scmp.lt.u32.totalorder %s1681_s15, %s1916_s2 }
  0x17   :  { %p1687_p10 = pnand %p1685_p9, %p1682_p8 }
  0x19   :  { %1690 = shalt.err (!%p1687_p10)
}
  0x1a   :  { %s1691_s20 = scalar_lea.vmem %s34_s12, 2048  ;;  %p1696_p12 = scmp.lt.s32.totalorder %s34_s12, %s34_s12 }
  0x1b   :  { %p1692_p11 = scmp.ne.s32.totalorder %s34_s12, %s1691_s20  ;;  %p1697_p13 = scmp.lt.s32.totalorder %s1691_s20, %s1691_s20 }
  0x1d   :  { %p1698_p0 = por %p1697_p13, %p1696_p12 }
  0x1f   :  { %p1699_p1 = pnand %p1698_p0, %p1692_p11 }
  0x21   :  { %1702 = shalt.err (!%p1699_p1)
}
  0x22   :  { %s1735_s1 = smov 64   ;;  %s1736_s21 = smov 4  }
  0x23   :  { %39 = dma.hbm_to_vmem [thread:$0]  %s1916_s2, 2048, %s34_s12, [#allocation6], %s1735_s1, %s1735_s1, %s1736_s21  }
  0x24   :  { %1725 = dma.done.wait [#allocation3], 12544  }
  0x25   :  { %1726 = vsyncadd [#allocation3], 4294954752 }
  0x26   :  { %1727 = dma.done.wait [#allocation6], 2048  }
  0x27   :  { %1728 = vsyncadd [#allocation6], 4294965248  ;;  %v1482_v0 = vld [vmem:[#allocation2 + $0x104] ss:$8 sps:$4 sm:$0xff]   ;;  %v1484_v1 = vld [vmem:[#allocation2 + $0x100] ss:$8 sps:$4 sm:$0xff]   ;;  %v65_v11 = vlaneseq }
  0x28   :  { %752 = vmatprep.subr.bf16.mxu0 %v1482_v0  ;;  %v1485_v2 = vld [vmem:[#allocation2 + $0x114] ss:$8 sps:$4 sm:$0xff]   ;;  %v1487_v3 = vld [vmem:[#allocation2 + $0x110] ss:$8 sps:$4 sm:$0xff]   ;;  %v1488_v4 = vld [vmem:[#allocation2 + $0x124] ss:$8 sps:$4 sm:$0xff]  }
  0x29   :  { %753 = vmatpush1.bf16.msra.mxu0 %v1484_v1  ;;  %v1490_v5 = vld [vmem:[#allocation2 + $0x120] ss:$8 sps:$4 sm:$0xff]   ;;  %v1491_v6 = vld [vmem:[#allocation2 + $0x134] ss:$8 sps:$4 sm:$0xff]   ;;  %v1493_v7 = vld [vmem:[#allocation2 + $0x130] ss:$8 sps:$4 sm:$0xff]  }
  0x2a   :  { %754 = vmatprep.subr.bf16.mxu0 %v1485_v2  ;;  %v1494_v8 = vld [vmem:[#allocation2 + $0x144] ss:$8 sps:$4 sm:$0xff]   ;;  %v1737_v9 = vmov 1983009808   ;;  %v1496_v12 = vld [vmem:[#allocation2 + $0x140] ss:$8 sps:$4 sm:$0xff]  }
  0x2b   :  { %v63_v10 = vunpack.c.l.s4 %v1737_v9  ;;  %v1497_v13 = vld [vmem:[#allocation2 + $0x154] ss:$8 sps:$4 sm:$0xff]   ;;  %v1801_v15 = vshrl.u32 %v65_v11, 7  ;;  %v1499_v16 = vld [vmem:[#allocation2 + $0x150] ss:$8 sps:$4 sm:$0xff]   ;;  %v57_v19 = vld [vmem:[%s1914_s0] sm:$0xff] }
  0x2c   :  { %v1500_v17 = vld [vmem:[#allocation2 + $0x164] ss:$8 sps:$4 sm:$0xff]   ;;  %v61_v20 = vcombine.high %v57_v19, %v57_v19  ;;  %v1502_v22 = vld [vmem:[#allocation2 + $0x160] ss:$8 sps:$4 sm:$0xff]   ;;  %v1503_v23 = vld [vmem:[#allocation2 + $0x174] ss:$8 sps:$4 sm:$0xff]  }
  0x2d   :  { %755 = vmatpush1.bf16.msra.mxu0 %v1487_v3  ;;  %v64_v14 = vunpack.c.0.s8 %v63_v10  ;;  %v1537_v26 = vld [vmem:[#allocation2 + $0x4] ss:$8 sps:$4 sm:$0xff]   ;;  %v1505_v27 = vld [vmem:[#allocation2 + $0x170] ss:$8 sps:$4 sm:$0xff]   ;;  %v1542_v29 = vld [vmem:[#allocation2] ss:$8 sps:$4 sm:$0xff]  }
  0x2e   :  { %756 = vmatprep.subr.bf16.mxu0 %v1488_v4  ;;  %711 = vmatprep.subr.bf16.mxu1 %v1537_v26  ;;  %v1543_v31 = vld [vmem:[#allocation2 + $0x14] ss:$8 sps:$4 sm:$0xff]   ;;  %v1506_v32 = vld [vmem:[#allocation2 + $0x184] ss:$8 sps:$4 sm:$0xff]   ;;  %v1548_v34 = vld [vmem:[#allocation2 + $0x10] ss:$8 sps:$4 sm:$0xff]  }
  0x2f   :  { %v1804_v18 = vsub.s32 %v64_v14, %v1801_v15  ;;  %712 = vmatpush1.bf16.msra.mxu1 %v1542_v29  ;;  %v1549_v35 = vld [vmem:[#allocation2 + $0x24] ss:$8 sps:$4 sm:$0xff]   ;;  %v1508_v36 = vld [vmem:[#allocation2 + $0x180] ss:$8 sps:$4 sm:$0xff]   ;;  %v1509_v37 = vld [vmem:[#allocation2 + $0x194] ss:$8 sps:$4 sm:$0xff]  }
  0x30   :  { %713 = vmatprep.subr.bf16.mxu1 %v1543_v31  ;;  %v1554_v38 = vld [vmem:[#allocation2 + $0x20] ss:$8 sps:$4 sm:$0xff]   ;;  %v1555_v39 = vld [vmem:[#allocation2 + $0x34] ss:$8 sps:$4 sm:$0xff]   ;;  %v1511_v40 = vld [vmem:[#allocation2 + $0x190] ss:$8 sps:$4 sm:$0xff]  }
  0x31   :  { %757 = vmatpush1.bf16.msra.mxu0 %v1490_v5  ;;  %v1810_v21 = vrot.slane %v57_v19, %v1804_v18  ;;  %v1813_v24 = vrot.slane %v61_v20, %v1804_v18  ;;  %v1512_v41 = vld [vmem:[#allocation2 + $0x1a4] ss:$8 sps:$4 sm:$0xff]   ;;  %v1560_v42 = vld [vmem:[#allocation2 + $0x30] ss:$8 sps:$4 sm:$0xff]   ;;  %v1514_v44 = vld [vmem:[#allocation2 + $0x1a0] ss:$8 sps:$4 sm:$0xff]  }
  0x32   :  { %758 = vmatprep.subr.bf16.mxu0 %v1491_v6  ;;  %v1561_v43 = vld [vmem:[#allocation2 + $0x44] ss:$8 sps:$4 sm:$0xff]   ;;  %v1515_v45 = vld [vmem:[#allocation2 + $0x1b4] ss:$8 sps:$4 sm:$0xff]   ;;  %v1566_v46 = vld [vmem:[#allocation2 + $0x40] ss:$8 sps:$4 sm:$0xff]  }
  0x33   :  { %v76_v25 = vcombine.high %v1810_v21, %v1810_v21  ;;  %v77_v28 = vcombine.high %v1813_v24, %v1813_v24  ;;  %714 = vmatpush1.bf16.msra.mxu1 %v1548_v34  ;;  %v1567_v47 = vld [vmem:[#allocation2 + $0x54] ss:$8 sps:$4 sm:$0xff]   ;;  %v1517_v48 = vld [vmem:[#allocation2 + $0x1b0] ss:$8 sps:$4 sm:$0xff]   ;;  %v1518_v49 = vld [vmem:[#allocation2 + $0x1c4] ss:$8 sps:$4 sm:$0xff]   ;;  %v103_v5 = vpack.c.bf16 %v1813_v24, %v1813_v24 }
  0x34   :  { %715 = vmatprep.subr.bf16.mxu1 %v1549_v35  ;;  %v1572_v50 = vld [vmem:[#allocation2 + $0x50] ss:$8 sps:$4 sm:$0xff]   ;;  %v1573_v51 = vld [vmem:[#allocation2 + $0x64] ss:$8 sps:$4 sm:$0xff]   ;;  %v1520_v52 = vld [vmem:[#allocation2 + $0x1c0] ss:$8 sps:$4 sm:$0xff]  }
  0x35   :  { %759 = vmatpush1.bf16.msra.mxu0 %v1493_v7  ;;  %v102_v30 = vpack.c.bf16 %v76_v25, %v76_v25  ;;  %v104_v33 = vpack.c.bf16 %v77_v28, %v77_v28  ;;  %v1521_v53 = vld [vmem:[#allocation2 + $0x1d4] ss:$8 sps:$4 sm:$0xff]   ;;  %v1578_v54 = vld [vmem:[#allocation2 + $0x60] ss:$8 sps:$4 sm:$0xff]   ;;  %v1523_v56 = vld [vmem:[#allocation2 + $0x1d0] ss:$8 sps:$4 sm:$0xff]  }
  0x36   :  { %760 = vmatprep.subr.bf16.mxu0 %v1494_v8  ;;  %v1579_v55 = vld [vmem:[#allocation2 + $0x74] ss:$8 sps:$4 sm:$0xff]   ;;  %v1524_v57 = vld [vmem:[#allocation2 + $0x1e4] ss:$8 sps:$4 sm:$0xff]   ;;  %v1584_v58 = vld [vmem:[#allocation2 + $0x70] ss:$8 sps:$4 sm:$0xff]  }
  0x37   :  { %743 = vmatprep.mubr.bf16.mxu1 %v102_v30  ;;  %784 = vmatprep.mubr.bf16.mxu0 %v104_v33  ;;  %v1585_v59 = vld [vmem:[#allocation2 + $0x84] ss:$8 sps:$4 sm:$0xff]   ;;  %v1526_v60 = vld [vmem:[#allocation2 + $0x1e0] ss:$8 sps:$4 sm:$0xff]   ;;  %v1527_v61 = vld [vmem:[#allocation2 + $0x1f4] ss:$8 sps:$4 sm:$0xff]  }
  0x38   :  { %716 = vmatpush1.bf16.msra.mxu1 %v1554_v38  ;;  %v1590_v62 = vld [vmem:[#allocation2 + $0x80] ss:$8 sps:$4 sm:$0xff]   ;;  %v1591_v63 = vld [vmem:[#allocation2 + $0x94] ss:$8 sps:$4 sm:$0xff]   ;;  %v1529_v0 = vld [vmem:[#allocation2 + $0x1f0] ss:$8 sps:$4 sm:$0xff]  }
  0x39   :  { %761 = vmatpush1.bf16.msra.mxu0 %v1496_v12  ;;  %717 = vmatprep.subr.bf16.mxu1 %v1555_v39  ;;  %v1533_v1 = vld [vmem:[#allocation2 + $0x204] ss:$8 sps:$4 sm:$0xff]   ;;  %v1596_v2 = vld [vmem:[#allocation2 + $0x90] ss:$8 sps:$4 sm:$0xff]   ;;  %v1531_v8 = vld [vmem:[#allocation2 + $0x200] ss:$8 sps:$4 sm:$0xff]   ;;  %v101_v39 = vpack.c.bf16 %v1810_v21, %v1810_v21 }
  0x3a   :  { %762 = vmatprep.subr.bf16.mxu0 %v1497_v13  ;;  %v1597_v3 = vld [vmem:[#allocation2 + $0xa4] ss:$8 sps:$4 sm:$0xff]   ;;  %v1536_v9 = vld [vmem:[#allocation2 + $0x214] ss:$8 sps:$4 sm:$0xff]   ;;  %v1602_v10 = vld [vmem:[#allocation2 + $0xa0] ss:$8 sps:$4 sm:$0xff]  }
  0x3b   :  { %v58_v4 = vld [vmem:[%s1914_s0 + $0x8] sm:$0x3f]  ;;  %v1603_v13 = vld [vmem:[#allocation2 + $0xb4] ss:$8 sps:$4 sm:$0xff]   ;;  %v1534_v14 = vld [vmem:[#allocation2 + $0x210] ss:$8 sps:$4 sm:$0xff]  }
  0x3c   :  { %718 = vmatpush1.bf16.msra.mxu1 %v1560_v42  ;;  %v78_v6 = vcombine.high %v58_v4, %v58_v4  ;;  %v1825_v7 = vrot.slane %v58_v4, %v1804_v18  ;;  %v1608_v19 = vld [vmem:[#allocation2 + $0xb0] ss:$8 sps:$4 sm:$0xff]   ;;  %v1609_v20 = vld [vmem:[#allocation2 + $0xc4] ss:$8 sps:$4 sm:$0xff]   ;;  %v1615_v24 = vld [vmem:[#allocation2 + $0xd4] ss:$8 sps:$4 sm:$0xff]  }
  0x3d   :  { %763 = vmatpush1.bf16.msra.mxu0 %v1499_v16  ;;  %719 = vmatprep.subr.bf16.mxu1 %v1561_v43  ;;  %v1545_v25 = vld [vmem:[#allocation2 + $0x230] ss:$8 sps:$4 sm:$0xff]   ;;  %v1553_v26 = vld [vmem:[#allocation2 + $0x244] ss:$8 sps:$4 sm:$0xff]   ;;  %v1551_v29 = vld [vmem:[#allocation2 + $0x240] ss:$8 sps:$4 sm:$0xff]  }
  0x3e   :  { %764 = vmatprep.subr.bf16.mxu0 %v1500_v17  ;;  %v1828_v11 = vrot.slane %v78_v6, %v1804_v18  ;;  %v93_v12 = vcombine.high %v1825_v7, %v1825_v7  ;;  %v1541_v17 = vld [vmem:[#allocation2 + $0x224] ss:$8 sps:$4 sm:$0xff]   ;;  %v1547_v18 = vld [vmem:[#allocation2 + $0x234] ss:$8 sps:$4 sm:$0xff]   ;;  %v1627_v31 = vld [vmem:[#allocation2 + $0xe0] ss:$8 sps:$4 sm:$0xff]  }
  0x3f   :  { %v1622_v28 = vld [vmem:[#allocation2 + $0xe4] ss:$8 sps:$4 sm:$0xff]   ;;  %v1559_v30 = vld [vmem:[#allocation2 + $0x254] ss:$8 sps:$4 sm:$0xff]   ;;  %v1557_v33 = vld [vmem:[#allocation2 + $0x250] ss:$8 sps:$4 sm:$0xff]  }
  0x40   :  { %720 = vmatpush1.bf16.msra.mxu1 %v1566_v46  ;;  %v106_v16 = vpack.c.bf16 %v93_v12, %v93_v12  ;;  %v1565_v34 = vld [vmem:[#allocation2 + $0x264] ss:$8 sps:$4 sm:$0xff]   ;;  %v1630_v35 = vld [vmem:[#allocation2 + $0xf0] ss:$8 sps:$4 sm:$0xff]   ;;  %v1571_v38 = vld [vmem:[#allocation2 + $0x274] ss:$8 sps:$4 sm:$0xff]  }
  0x41   :  { %765 = vmatpush1.bf16.msra.mxu0 %v1502_v22  ;;  %721 = vmatprep.subr.bf16.mxu1 %v1567_v47  ;;  %v1539_v22 = vld [vmem:[#allocation2 + $0x220] ss:$8 sps:$4 sm:$0xff]   ;;  %v1569_v42 = vld [vmem:[#allocation2 + $0x270] ss:$8 sps:$4 sm:$0xff]   ;;  %v1577_v43 = vld [vmem:[#allocation2 + $0x284] ss:$8 sps:$4 sm:$0xff]  }
  0x42   :  { %766 = vmatprep.subr.bf16.mxu0 %v1503_v23  ;;  %v1614_v23 = vld [vmem:[#allocation2 + $0xc0] ss:$8 sps:$4 sm:$0xff]   ;;  %v1583_v47 = vld [vmem:[#allocation2 + $0x294] ss:$8 sps:$4 sm:$0xff]   ;;  %v1738_v4 = vmov 0   ;;  %vm707_vm0 = vcmask 130048  }
  0x43   :  { %v1575_v46 = vld [vmem:[#allocation2 + $0x280] ss:$8 sps:$4 sm:$0xff]   ;;  %v1641_v6 = vld [vmem:[#allocation5 + $0x68] sm:$0xff]   ;;  %vm1740_vm1 = vmmov 0   ;;  %vm1199_vm2 = vcmask 523264   ;;  %s1741_s30 = smov [#allocation7]  }
  0x44   :  { %722 = vmatpush1.bf16.msra.mxu1 %v1572_v50  ;;  %v1636_v21 = vld [vmem:[#allocation5 + $0x10] sm:$0xff]   ;;  %v1646_v12 = vld [vmem:[#allocation5 + $0x38] sm:$0xff]  }
  0x45   :  { %767 = vmatpush1.bf16.msra.mxu0 %v1505_v27  ;;  %723 = vmatprep.subr.bf16.mxu1 %v1573_v51  ;;  %v1620_v27 = vld [vmem:[#allocation2 + $0xd0] ss:$8 sps:$4 sm:$0xff]   ;;  %v1589_v50 = vld [vmem:[#allocation2 + $0x2a4] ss:$8 sps:$4 sm:$0xff]  }
  0x46   :  { %768 = vmatprep.subr.bf16.mxu0 %v1506_v32  ;;  %v1628_v32 = vld [vmem:[#allocation2 + $0xf4] ss:$8 sps:$4 sm:$0xff]   ;;  %v1638_v51 = vld [vmem:[#allocation5 + $0x18] sm:$0xff]  }
  0x48   :  { %724 = vmatpush1.bf16.msra.mxu1 %v1578_v54  ;;  %v1595_v54 = vld [vmem:[#allocation2 + $0x2b4] ss:$8 sps:$4 sm:$0xff]  }
  0x49   :  { %769 = vmatpush1.bf16.msra.mxu0 %v1508_v36  ;;  %725 = vmatprep.subr.bf16.mxu1 %v1579_v55  ;;  %v1631_v36 = vld [vmem:[#allocation5 + $0x40] sm:$0xff]  }
  0x4a   :  { %770 = vmatprep.subr.bf16.mxu0 %v1509_v37  ;;  %v1563_v37 = vld [vmem:[#allocation2 + $0x260] ss:$8 sps:$4 sm:$0xff]   ;;  %v1640_v55 = vld [vmem:[#allocation5 + $0x20] sm:$0xff]  }
  0x4c   :  { %726 = vmatpush1.bf16.msra.mxu1 %v1584_v58  ;;  %v1599_v58 = vld [vmem:[#allocation2 + $0x2c0] ss:$8 sps:$4 sm:$0xff]  }
  0x4d   :  { %771 = vmatpush1.bf16.msra.mxu0 %v1511_v40  ;;  %727 = vmatprep.subr.bf16.mxu1 %v1585_v59  ;;  %v1632_v40 = vld [vmem:[#allocation5] sm:$0xff]  }
  0x4e   :  { %772 = vmatprep.subr.bf16.mxu0 %v1512_v41  ;;  %v1633_v41 = vld [vmem:[#allocation5 + $0x48] sm:$0xff]  }
  0x4f   :  { %v1607_v59 = vld [vmem:[#allocation2 + $0x2d4] ss:$8 sps:$4 sm:$0xff]  }
  0x50   :  { %728 = vmatpush1.bf16.msra.mxu1 %v1590_v62  ;;  %v1611_v62 = vld [vmem:[#allocation2 + $0x2e0] ss:$8 sps:$4 sm:$0xff]  }
  0x51   :  { %773 = vmatpush1.bf16.msra.mxu0 %v1514_v44  ;;  %729 = vmatprep.subr.bf16.mxu1 %v1591_v63  ;;  %v1634_v44 = vld [vmem:[#allocation5 + $0x8] sm:$0xff]  }
  0x52   :  { %774 = vmatprep.subr.bf16.mxu0 %v1515_v45  ;;  %v1635_v45 = vld [vmem:[#allocation5 + $0x50] sm:$0xff]   ;;  %v1619_v63 = vld [vmem:[#allocation2 + $0x2f4] ss:$8 sps:$4 sm:$0xff]  }
  0x54   :  { %730 = vmatpush1.bf16.msra.mxu1 %v1596_v2  ;;  %v105_v2 = vpack.c.bf16 %v1825_v7, %v1825_v7  ;;  %v1645_v7 = vld [vmem:[#allocation5 + $0x78] sm:$0xff]  }
  0x55   :  { %775 = vmatpush1.bf16.msra.mxu0 %v1517_v48  ;;  %731 = vmatprep.subr.bf16.mxu1 %v1597_v3  ;;  %v1637_v48 = vld [vmem:[#allocation5 + $0x58] sm:$0xff]  }
  0x56   :  { %776 = vmatprep.subr.bf16.mxu0 %v1518_v49  ;;  %v1581_v49 = vld [vmem:[#allocation2 + $0x290] ss:$8 sps:$4 sm:$0xff]   ;;  %v1624_v3 = vld [vmem:[#allocation2 + $0x300] ss:$8 sps:$4 sm:$0xff]  }
  0x58   :  { %732 = vmatpush1.bf16.msra.mxu1 %v1602_v10  ;;  %v1644_v10 = vld [vmem:[#allocation5 + $0x30] sm:$0xff]  }
  0x59   :  { %777 = vmatpush1.bf16.msra.mxu0 %v1520_v52  ;;  %733 = vmatprep.subr.bf16.mxu1 %v1603_v13  ;;  %v1639_v52 = vld [vmem:[#allocation5 + $0x60] sm:$0xff]   ;;  %v1739_v13 = vmov 0.0  }
  0x5a   :  { %778 = vmatprep.subr.bf16.mxu0 %v1521_v53  ;;  %v1587_v53 = vld [vmem:[#allocation2 + $0x2a0] ss:$8 sps:$4 sm:$0xff]  }
  0x5c   :  { %734 = vmatpush1.bf16.msra.mxu1 %v1608_v19  ;;  %v209_v19 = vsub.s32 0, %v1801_v15 }
  0x5d   :  { %779 = vmatpush1.bf16.msra.mxu0 %v1523_v56  ;;  %735 = vmatprep.subr.bf16.mxu1 %v1609_v20  ;;  %v1593_v56 = vld [vmem:[#allocation2 + $0x2b0] ss:$8 sps:$4 sm:$0xff]   ;;  %v53_v20 = vld [vmem:[%s1919_s5] ss:$4 sm:$0x3] }
  0x5e   :  { %780 = vmatprep.subr.bf16.mxu0 %v1524_v57  ;;  %v1601_v57 = vld [vmem:[#allocation2 + $0x2c4] ss:$8 sps:$4 sm:$0xff]  }
  0x60   :  { %736 = vmatpush1.bf16.msra.mxu1 %v1614_v23 }
  0x61   :  { %781 = vmatpush1.bf16.msra.mxu0 %v1526_v60  ;;  %737 = vmatprep.subr.bf16.mxu1 %v1615_v24  ;;  %v1605_v60 = vld [vmem:[#allocation2 + $0x2d0] ss:$8 sps:$4 sm:$0xff]  }
  0x62   :  { %782 = vmatprep.subr.bf16.mxu0 %v1527_v61  ;;  %v1613_v61 = vld [vmem:[#allocation2 + $0x2e4] ss:$8 sps:$4 sm:$0xff]  }
  0x64   :  { %738 = vmatpush1.bf16.msra.mxu1 %v1620_v27 }
  0x65   :  { %783 = vmatpush1.bf16.msra.mxu0 %v1529_v0  ;;  %739 = vmatprep.subr.bf16.mxu1 %v1622_v28  ;;  %v1617_v0 = vld [vmem:[#allocation2 + $0x2f0] ss:$8 sps:$4 sm:$0xff]  }
  0x66   :  { %793 = vmatprep.subr.bf16.mxu0 %v1533_v1  ;;  %v1626_v1 = vld [vmem:[#allocation2 + $0x304] ss:$8 sps:$4 sm:$0xff]  }
  0x68   :  { %785 = vmatmul.mubr.bf16.vlgmr.msra.gmra.mrb[0].mxu0 %v103_v5  ;;  %740 = vmatpush1.bf16.msra.mxu1 %v1627_v31  ;;  %v107_v5 = vpack.c.bf16 %v1828_v11, %v1828_v11 }
  0x69   :  { %794 = vmatpush1.bf16.msra.mxu0 %v1531_v8  ;;  %825 = vmatprep.mubr.bf16.mxu0 %v106_v16  ;;  %v1642_v8 = vld [vmem:[#allocation5 + $0x28] sm:$0xff]  }
  0x6a   :  { %795 = vmatprep.subr.bf16.mxu0 %v1536_v9  ;;  %741 = vmatprep.subr.bf16.mxu1 %v1628_v32  ;;  %v1643_v9 = vld [vmem:[#allocation5 + $0x70] sm:$0xff]  }
  0x6c   :  { %742 = vmatpush1.bf16.msra.mxu1 %v1630_v35  ;;  %v1647_v35 = vld [vmem:[%s1917_s3] sm:$0xff]  }
  0x6d   :  { %796 = vmatpush1.bf16.msra.mxu0 %v1534_v14  ;;  %1391 = vmatprep.subr.bf16.mxu1 %v1631_v36 }
  0x6e   :  { %797 = vmatprep.subr.bf16.mxu0 %v1541_v17 }
  0x6f   :  { %744 = vmatmul.mubr.bf16.vlgmr.msra.gmra.mrb[0].mxu1 %v101_v39  ;;  %v1651_v39 = vld [vmem:[%s1917_s3 + $0x20] sm:$0xff]  }
  0x70   :  { %1392 = vmatpush3.bf16.msra.mxu1 %v1632_v40  ;;  %v1652_v40 = vld [vmem:[%s1917_s3 + $0x28] sm:$0xff]  }
  0x71   :  { %798 = vmatpush1.bf16.msra.mxu0 %v1539_v22  ;;  %1393 = vmatprep.subr.bf16.mxu1 %v1633_v41  ;;  %v213_v22 = vsub.s32 1, %v1801_v15  ;;  %v1648_v15 = vld [vmem:[%s1917_s3 + $0x8] sm:$0xff]   ;;  %v1653_v41 = vld [vmem:[%s1917_s3 + $0x30] sm:$0xff]  }
  0x72   :  { %799 = vmatprep.subr.bf16.mxu0 %v1547_v18  ;;  %v210_v18 = vrot.slane %v53_v20, %v209_v19 }
  0x73   :  { %v214_v23 = vrot.slane %v53_v20, %v213_v22 }
  0x74   :  { %1394 = vmatpush3.bf16.msra.mxu1 %v1634_v44  ;;  %v1359_v44 = vld [vmem:[%s1919_s5 + $0x1] ss:$0 sm:$0xff] }
  0x75   :  { %800 = vmatpush1.bf16.msra.mxu0 %v1545_v25  ;;  %1395 = vmatprep.subr.bf16.mxu1 %v1635_v45 }
  0x76   :  { %801 = vmatprep.subr.bf16.mxu0 %v1553_v26 }
  0x78   :  { %1396 = vmatpush3.bf16.msra.mxu1 %v1636_v21 }
  0x79   :  { %802 = vmatpush1.bf16.msra.mxu0 %v1551_v29  ;;  %1397 = vmatprep.subr.bf16.mxu1 %v1637_v48 }
  0x7a   :  { %803 = vmatprep.subr.bf16.mxu0 %v1559_v30 }
  0x7c   :  { %1398 = vmatpush3.bf16.msra.mxu1 %v1638_v51 }
  0x7d   :  { %804 = vmatpush1.bf16.msra.mxu0 %v1557_v33  ;;  %1399 = vmatprep.subr.bf16.mxu1 %v1639_v52  ;;  %v1656_v52 = vld [vmem:[%s1918_s4 + $0x8] sm:$0xff]  }
  0x7e   :  { %805 = vmatprep.subr.bf16.mxu0 %v1565_v34 }
  0x80   :  { %1400 = vmatpush3.bf16.msra.mxu1 %v1640_v55  ;;  %v1376_v55 = vld [vmem:[%s1919_s5 + $0x2] ss:$0 sm:$0xff] }
  0x81   :  { %806 = vmatpush1.bf16.msra.mxu0 %v1563_v37  ;;  %1401 = vmatprep.subr.bf16.mxu1 %v1641_v6  ;;  %v1649_v37 = vld [vmem:[%s1917_s3 + $0x10] sm:$0xff]  }
  0x82   :  { %807 = vmatprep.subr.bf16.mxu0 %v1571_v38  ;;  %v1650_v38 = vld [vmem:[%s1917_s3 + $0x18] sm:$0xff]  }
  0x84   :  { %1402 = vmatpush3.bf16.msra.mxu1 %v1642_v8 }
  0x85   :  { %808 = vmatpush1.bf16.msra.mxu0 %v1569_v42  ;;  %1403 = vmatprep.subr.bf16.mxu1 %v1643_v9  ;;  %v1654_v42 = vld [vmem:[%s1917_s3 + $0x38] sm:$0xff]  }
  0x86   :  { %809 = vmatprep.subr.bf16.mxu0 %v1577_v43 }
  0x88   :  { %1404 = vmatpush3.bf16.msra.mxu1 %v1644_v10 }
  0x89   :  { %810 = vmatpush1.bf16.msra.mxu0 %v1575_v46  ;;  %1405 = vmatprep.subr.bf16.mxu1 %v1645_v7 }
  0x8a   :  { %811 = vmatprep.subr.bf16.mxu0 %v1583_v47 }
  0x8c   :  { %1406 = vmatpush3.bf16.msra.mxu1 %v1646_v12 }
  0x8d   :  { %812 = vmatpush1.bf16.msra.mxu0 %v1581_v49  ;;  %1427 = vmatprep.subr.bf16.mxu1 %v1739_v13 }
  0x8e   :  { %813 = vmatprep.subr.bf16.mxu0 %v1589_v50  ;;  %v1655_v50 = vld [vmem:[%s1918_s4] sm:$0xff]  }
  0x91   :  { %814 = vmatpush1.bf16.msra.mxu0 %v1587_v53  ;;  %v1657_v53 = vld [vmem:[%s1918_s4 + $0x10] sm:$0xff]  }
  0x92   :  { %815 = vmatprep.subr.bf16.mxu0 %v1595_v54  ;;  %v1658_v54 = vld [vmem:[%s1918_s4 + $0x18] sm:$0xff]   ;;  %s1250_s4 = sshll.u32 %s1741_s30, 4  ;;  %s1251_s4 = int_to_ptr.vmem [resolvable:$true] %s1250_s4 }
  0x93   :  { %s1703_s7 = scalar_lea.vmem %s1251_s4, 32  ;;  %p1708_p3 = scmp.lt.s32.totalorder %s1251_s4, %s1251_s4 }
  0x94   :  { %p1704_p2 = scmp.ne.s32.totalorder %s1251_s4, %s1703_s7  ;;  %p1709_p4 = scmp.lt.s32.totalorder %s1703_s7, %s1703_s7 }
  0x95   :  { %816 = vmatpush1.bf16.msra.mxu0 %v1593_v56 }
  0x96   :  { %817 = vmatprep.subr.bf16.mxu0 %v1601_v57  ;;  %p1710_p5 = por %p1709_p4, %p1708_p3 }
  0x98   :  { %p1711_p6 = pnand %p1710_p5, %p1704_p2 }
  0x99   :  { %818 = vmatpush1.bf16.msra.mxu0 %v1599_v58 }
  0x9a   :  { %819 = vmatprep.subr.bf16.mxu0 %v1607_v59 }
  0x9d   :  { %820 = vmatpush1.bf16.msra.mxu0 %v1605_v60 }
  0x9e   :  { %821 = vmatprep.subr.bf16.mxu0 %v1613_v61 }
  0xa1   :  { %822 = vmatpush1.bf16.msra.mxu0 %v1611_v62 }
  0xa2   :  { %823 = vmatprep.subr.bf16.mxu0 %v1619_v63  ;;  %v1385_v63 = vld [vmem:[%s1919_s5 + $0x3] ss:$0 sm:$0xff] }
  0xa5   :  { %824 = vmatpush1.bf16.msra.mxu0 %v1617_v0 }
  0xa6   :  { %834 = vmatprep.subr.bf16.mxu0 %v1626_v1 }
  0xa8   :  { %826 = vmatmul.mubr.bf16.vlgmr.msra.gmra.mrb[0].mxu0 %v105_v2 }
  0xa9   :  { %835 = vmatpush1.bf16.msra.mxu0 %v1624_v3  ;;  %866 = vmatprep.mubr.bf16.mxu0 %v1738_v4 }
  0xb4   :  { %1358 = vmatmul.mubr.msk.bf16.vlgmr.msra.gmra.mrb[0].mxu0 %vm707_vm0, %v107_v5 }
 0x142   :  { %v745_v14 = vpop.f32.mrb[0].mxu1 }
 0x143   :  { %v747_v16 = vpop.f32.mrb[1].mxu1  ;;  %v746_v24 = vadd.f32 %v745_v14, %v210_v18 }
 0x144   :  { %v749_v11 = vpop.f32.mrb[2].mxu1  ;;  %v748_v25 = vadd.f32 %v747_v16, %v214_v23 }
 0x145   :  { %v750_v17 = vpop.f32.mrb[3].mxu1 }
 0x187   :  { %v868_v26 = vpop.f32.mrb[0].mxu0 }
 0x188   :  { %v1460_v27 = vadd.f32 %v868_v26, %v746_v24  ;;  %v870_v28 = vpop.f32.mrb[1].mxu0 }
 0x189   :  { %v1462_v29 = vadd.f32 %v870_v28, %v748_v25  ;;  %v872_v30 = vpop.f32.mrb[2].mxu0 }
 0x18a   :  { %v875_v31 = vmax.f32 %v1460_v27, 0.0  ;;  %v873_v32 = vpop.f32.mrb[3].mxu0 }
 0x18b   :  { %v876_v33 = vmax.f32 %v1462_v29, 0.0 }
 0x18c   :  { %v877_v36 = vpack.c.bf16 %v875_v31, %v875_v31 }
 0x18d   :  { %v878_v34 = vpack.c.bf16 %v876_v33, %v876_v33 }
 0x18f   :  { %1043 = vmatprep.mubr.bf16.mxu1 %v878_v34 }
 0x190   :  { %1044 = vmatmul.mubr.bf16.vlgmr.msra.gmra.mrb[4].mxu1 %v877_v36 }
 0x191   :  { %1428 = vmatpush3.bf16.msra.mxu1 %v1647_v35  ;;  %1443 = vmatprep.mubr.msk.bf16.mxu1 %vm1740_vm1, %v1739_v13 }
 0x192   :  { %1429 = vmatprep.subr.bf16.mxu1 %v1739_v13 }
 0x195   :  { %1430 = vmatpush3.bf16.msra.mxu1 %v1648_v15 }
 0x196   :  { %1431 = vmatprep.subr.bf16.mxu1 %v1739_v13 }
 0x199   :  { %1432 = vmatpush3.bf16.msra.mxu1 %v1649_v37 }
 0x19a   :  { %1433 = vmatprep.subr.bf16.mxu1 %v1739_v13 }
 0x19d   :  { %1434 = vmatpush3.bf16.msra.mxu1 %v1650_v38 }
 0x19e   :  { %1435 = vmatprep.subr.bf16.mxu1 %v1739_v13 }
 0x1a1   :  { %1436 = vmatpush3.bf16.msra.mxu1 %v1651_v39 }
 0x1a2   :  { %1437 = vmatprep.subr.bf16.mxu1 %v1739_v13 }
 0x1a5   :  { %1438 = vmatpush3.bf16.msra.mxu1 %v1652_v40 }
 0x1a6   :  { %1439 = vmatprep.subr.bf16.mxu1 %v1739_v13 }
 0x1a9   :  { %1440 = vmatpush3.bf16.msra.mxu1 %v1653_v41 }
 0x1aa   :  { %1441 = vmatprep.subr.bf16.mxu1 %v1739_v13 }
 0x1ad   :  { %1442 = vmatpush3.bf16.msra.mxu1 %v1654_v42 }
 0x1ae   :  { %1447 = vmatprep.subr.bf16.mxu1 %v1739_v13 }
 0x263   :  { %v1407_v43 = vpop.f32.mrb[4].mxu1 }
 0x264   :  { %v1408_v45 = vpop.f32.mrb[5].mxu1 }
 0x265   :  { %v1409_v46 = vadd.f32 %v1408_v45, %v1407_v43  ;;  %v1410_v47 = vpop.f32.mrb[6].mxu1 }
 0x266   :  { %v1411_v21 = vpop.f32.mrb[7].mxu1 }
 0x267   :  { %v1046_v48 = vadd.f32 %v1409_v46, %v1359_v44 }
 0x269   :  { %v1051_v49 = vmax.f32 %v1046_v48, 0.0 }
 0x26b   :  { %v1052_v51 = vpack.c.bf16 %v1051_v49, %v1051_v49 }
 0x26d   :  { %1444 = vmatmul.mubr.bf16.vlgmr.msra.gmra.mrb[8].mxu1 %v1052_v51 }
 0x26e   :  { %1448 = vmatpush3.bf16.msra.mxu1 %v1655_v50  ;;  %1455 = vmatprep.mubr.msk.bf16.mxu1 %vm1740_vm1, %v1739_v13 }
 0x26f   :  { %1449 = vmatprep.subr.bf16.mxu1 %v1739_v13 }
 0x272   :  { %1450 = vmatpush3.bf16.msra.mxu1 %v1656_v52 }
 0x273   :  { %1451 = vmatprep.subr.bf16.mxu1 %v1739_v13 }
 0x276   :  { %1452 = vmatpush3.bf16.msra.mxu1 %v1657_v53 }
 0x277   :  { %1453 = vmatprep.subr.bf16.mxu1 %v1739_v13 }
 0x27a   :  { %1454 = vmatpush3.bf16.msra.mxu1 %v1658_v54 }
 0x340   :  { %v1155_v56 = vpop.f32.mrb[8].mxu1 }
 0x341   :  { %v1156_v57 = vadd.f32 %v1376_v55, %v1155_v56  ;;  %v1445_v58 = vpop.f32.mrb[9].mxu1 }
 0x342   :  { %v1158_v59 = vpop.f32.mrb[10].mxu1 }
 0x343   :  { %v1161_v60 = vmax.f32 %v1156_v57, 0.0  ;;  %v1446_v61 = vpop.f32.mrb[11].mxu1 }
 0x345   :  { %v1162_v62 = vpack.c.bf16 %v1161_v60, %v1161_v60 }
 0x347   :  { %1456 = vmatmul.mubr.msk.bf16.vlgmr.msra.gmra.mrb[12].mxu1 %vm1199_vm2, %v1162_v62 }
 0x41a   :  { %v1237_v0 = vpop.f32.mrb[12].mxu1 }
 0x41b   :  { %v1238_v1 = vadd.f32 %v1385_v63, %v1237_v0  ;;  %v1457_v2 = vpop.f32.mrb[13].mxu1 }
 0x41c   :  { %v1240_v3 = vpop.f32.mrb[14].mxu1 }
 0x41d   :  { %1243 = vst [vmem:[#allocation7] sm:$0x3] %v1238_v1  ;;  %v1458_v4 = vpop.f32.mrb[15].mxu1 }
 0x41e   :  { %1714 = shalt.err (!%p1711_p6)
}
 0x41f   :  { %s1715_s5 = scalar_lea.hbm %s1920_s6, 32 }
 0x420   :  { %p1716_p7 = scmp.ne.s32.totalorder %s1920_s6, %s1715_s5  ;;  %p1719_p8 = scmp.lt.u32.totalorder %s1715_s5, %s1920_s6 }
 0x422   :  { %p1721_p9 = pnand %p1719_p8, %p1716_p7 }
 0x424   :  { %1724 = shalt.err (!%p1721_p9)
}
 0x425   :  { %1253 = dma.vmem_to_hbm [thread:$0]  %s1251_s4, 32, %s1920_s6, [#allocation4]  }
 0x426   :  { %1729 = dma.done.wait [#allocation4], 32  }
 0x427   :  { %1730 = vsyncadd [#allocation4], 4294967264 }
 0x428   :  { %1257 = vsyncpa [#allocation3], 1 }
 0x429   :  { %1258 = vsyncpa [#allocation6], 1 }
 0x42a   :  { %1259 = vsyncpa [#allocation4], 1 }

</bundles_post_ra>
